<compile_context>
chip_gen: v5e
topology: v5e:2x2
jax: 0.10.0
libtpu: 0.0.40
codegen_flags: <defaults>
</compile_context>

<pallas_src>
import functools
from typing import NamedTuple

import jax
import jax.numpy as jnp
from jax.experimental import pallas as pl
from jax.experimental.pallas import tpu as pltpu


def _round_up(x, m):
    return ((x + m - 1) // m) * m


class _Meta(NamedTuple):
    obs_dim: int
    action_dim: int
    hidden_pad: int   # padded hidden width (N of w1/w2, K of head)
    out_pad: int      # padded packed-head width (>= 2 * action_dim)
    block_k: int      # hidden K-tile (== hidden_pad when fully resident)


# ----------------------------------------------------------------------------
# Kernel
# ----------------------------------------------------------------------------
def gaussian_policy_kernel(x_ref, w1_ref, b1_ref, w2_ref, b2_ref,
                           wh_ref, bh_ref, out_ref, acc_ref, *, action_dim):
    """Trunk Linear->Tanh->Linear->Tanh, fused mu/cov head.

    Grid: (batch_tiles, k_tiles).  The inner 'arbitrary' axis streams the
    hidden dimension: each step computes one column-block of h1 and
    accumulates its contribution to z2 = h1 @ w2 in an f32 VMEM scratch.
    The head runs once, on the last K step.
    """
    k = pl.program_id(1)

    @pl.when(k == 0)
    def _():
        acc_ref[...] = jnp.zeros_like(acc_ref)

    # h1 column-block for this K step (f32 tanh; bf16 only on MXU operands).
    h1 = jnp.tanh(
        jnp.dot(x_ref[...], w1_ref[...], preferred_element_type=jnp.float32)
        + b1_ref[...])
    acc_ref[...] += jnp.dot(h1.astype(w2_ref.dtype), w2_ref[...],
                            preferred_element_type=jnp.float32)

    @pl.when(k == pl.num_programs(1) - 1)
    def _():
        h2 = jnp.tanh(acc_ref[...] + b2_ref[...])
        # Fused head: columns [0, A) = mu head, [A, 2A) = cov head, rest pad.
        z = (jnp.dot(h2.astype(wh_ref.dtype), wh_ref[...],
                     preferred_element_type=jnp.float32) + bh_ref[...])
        mu = jnp.tanh(z)
        # exp(2 * softplus(z)) == (1 + e^z)^2  -> single EUP transcendental.
        t = jnp.exp(z)
        cov = (1.0 + t) * (1.0 + t)
        lane = jax.lax.broadcasted_iota(jnp.int32, z.shape, dimension=1)
        out_ref[...] = jnp.where(lane < action_dim, mu, cov).astype(out_ref.dtype)


# ----------------------------------------------------------------------------
# One-time parameter preparation (hoisted out of the forward path)
# ----------------------------------------------------------------------------
def prepare_params(params, *, compute_dtype=jnp.bfloat16,
                   max_resident_hidden=2048, block_hidden=512):
    """Pad / pack / cast weights once.  Call at init or after a param update."""
    obs_dim, hidden = params["w1"].shape
    A = params["wmu"].shape[1]

    H_p = _round_up(hidden, 128)
    if H_p <= max(max_resident_hidden, 128):
        TK = H_p                              # fully VMEM-resident weights
    else:
        TK = _round_up(min(block_hidden, H_p), 128)
        H_p = _round_up(H_p, TK)              # stream hidden over a K grid axis
    OUT_P = _round_up(2 * A, 128)

    def pad2(a, rows, cols):
        return jnp.pad(a, ((0, rows - a.shape[0]), (0, cols - a.shape[1])))

    # Pack the two heads: cols [0, A) = mu weights, [A, 2A) = cov weights.
    wh = jnp.concatenate([params["wmu"], params["wcov"]], axis=1)
    bh = jnp.concatenate([params["bmu"], params["bcov"]], axis=1)

    arrays = {
        # w1 rows stay at obs_dim (x is NOT lane-padded); only N dims padded.
        "w1": pad2(params["w1"], obs_dim, H_p).astype(compute_dtype),
        "b1": pad2(params["b1"], 1, H_p).astype(jnp.float32),
        "w2": pad2(params["w2"], H_p, H_p).astype(compute_dtype),
        "b2": pad2(params["b2"], 1, H_p).astype(jnp.float32),
        "wh": pad2(wh, H_p, OUT_P).astype(compute_dtype),
        "bh": pad2(bh, 1, OUT_P).astype(jnp.float32),
    }
    meta = _Meta(obs_dim, A, H_p, OUT_P, TK)
    return arrays, meta


# ----------------------------------------------------------------------------
# Forward
# ----------------------------------------------------------------------------
@functools.partial(jax.jit, static_argnums=(2, 3))
def _forward_impl(x, arrays, meta, block_batch):
    B, obs_dim = x.shape
    assert obs_dim == meta.obs_dim, (obs_dim, meta.obs_dim)
    A, H_p, OUT_P, TK = meta.action_dim, meta.hidden_pad, meta.out_pad, meta.block_k
    cdt = arrays["w1"].dtype
    cbytes = jnp.dtype(cdt).itemsize
    row_mult = 16 if cdt == jnp.bfloat16 else 8   # bf16 packs 2 rows / sublane

    # Batch tiling: >= 2 tiles when possible (v7x megacore), near-even split.
    B8 = _round_up(B, row_mult)
    n_tiles = max(1, pl.cdiv(B8, block_batch))
    if B8 >= 2 * row_mult:
        n_tiles = max(2, n_tiles)
    TB = _round_up(pl.cdiv(B8, n_tiles), row_mult)
    B_p = _round_up(B8, TB)

    x_p = jnp.pad(x, ((0, B_p - B), (0, 0))).astype(cdt)

    k_tiles = H_p // TK
    k_const = (k_tiles == 1)
    grid = (B_p // TB, k_tiles)

    def spec(shape, index_map, *, constant):
        if constant:
            # Constant index_map -> single-buffer (no pointless double copy).
            return pl.BlockSpec(shape, index_map, pipeline_mode=pl.Buffered(1))
        return pl.BlockSpec(shape, index_map)

    in_specs = [
        pl.BlockSpec((TB, obs_dim), lambda i, k: (i, 0)),              # x
        spec((obs_dim, TK), lambda i, k: (0, k), constant=k_const),    # w1
        spec((1, TK),       lambda i, k: (0, k), constant=k_const),    # b1
        spec((TK, H_p),     lambda i, k: (k, 0), constant=k_const),    # w2
        spec((1, H_p),      lambda i, k: (0, 0), constant=True),       # b2
        spec((H_p, OUT_P),  lambda i, k: (0, 0), constant=True),       # wh (packed)
        spec((1, OUT_P),    lambda i, k: (0, 0), constant=True),       # bh (packed)
    ]

    # Explicit VMEM budget: weights (single/double buffered as above) +
    # double-buffered x/out tiles + f32 accumulator, with headroom.
    wbuf = 1 if k_const else 2
    est = (wbuf * (obs_dim * TK * cbytes + TK * 4 + TK * H_p * cbytes)
           + H_p * 4 + H_p * OUT_P * cbytes + OUT_P * 4
           + 2 * TB * obs_dim * cbytes
           + 2 * TB * OUT_P * 4
           + TB * H_p * 4)
    vmem_limit = min(max(int(1.5 * est) + (2 << 20), 16 << 20), 100 << 20)

    out = pl.pallas_call(
        functools.partial(gaussian_policy_kernel, action_dim=A),
        out_shape=jax.ShapeDtypeStruct((B_p, OUT_P), jnp.float32),
        grid=grid,
        in_specs=in_specs,
        out_specs=pl.BlockSpec((TB, OUT_P), lambda i, k: (i, 0)),
        scratch_shapes=[pltpu.VMEM((TB, H_p), jnp.float32)],
        compiler_params=pltpu.CompilerParams(
            dimension_semantics=("parallel", "arbitrary"),
            vmem_limit_bytes=vmem_limit),
    )(x_p, arrays["w1"], arrays["b1"], arrays["w2"], arrays["b2"],
      arrays["wh"], arrays["bh"])

    mu = out[:B, :A]
    cov = out[:B, A:2 * A]
    return mu, cov


def gaussian_policy_forward(x, prepared, *, block_batch=512):
    arrays, meta = prepared
    return _forward_impl(x, arrays, meta, block_batch)


# ----------------------------------------------------------------------------
# Reference + init
# ----------------------------------------------------------------------------
def _reference_forward(x, p):
    h1 = jnp.tanh(x @ p["w1"] + p["b1"])
    h2 = jnp.tanh(h1 @ p["w2"] + p["b2"])
    mu = jnp.tanh(h2 @ p["wmu"] + p["bmu"])
    log_cov = jax.nn.softplus(h2 @ p["wcov"] + p["bcov"])
    cov = jnp.exp(log_cov) ** 2
    return mu, cov


def init_params(key, obs_dim, hidden_dim, action_dim):
    ks = jax.random.split(key, 4)

    def lin(kw, fan_in, fan_out, std):
        return jax.random.normal(kw, (fan_in, fan_out), jnp.float32) * std

    return {
        "w1": lin(ks[0], obs_dim, hidden_dim, 1.0 / jnp.sqrt(obs_dim)),
        "b1": jnp.zeros((1, hidden_dim), jnp.float32),
        "w2": lin(ks[1], hidden_dim, hidden_dim, 1.0 / jnp.sqrt(hidden_dim)),
        "b2": jnp.zeros((1, hidden_dim), jnp.float32),
        "wmu": lin(ks[2], obs_dim * 0 + hidden_dim, action_dim, 0.01),
        "bmu": jnp.zeros((1, action_dim), jnp.float32),
        "wcov": lin(ks[3], hidden_dim, action_dim, 0.01),
        "bcov": jnp.zeros((1, action_dim), jnp.float32),
    }


if __name__ == "__main__":
    batch, obs_dim, hidden_dim, action_dim = 8, 16, 32, 4

    key = jax.random.PRNGKey(0)
    k_x, k_p = jax.random.split(key)
    x = jax.random.normal(k_x, (batch, obs_dim), jnp.float32)
    params = init_params(k_p, obs_dim, hidden_dim, action_dim)
    mu_ref, cov_ref = _reference_forward(x, params)

    # 1) Exact-precision path: f32 MXU operands, fully resident weights.
    prep_f32 = prepare_params(params, compute_dtype=jnp.float32)
    mu, cov = gaussian_policy_forward(x, prep_f32)
    jax.block_until_ready((mu, cov))
    assert mu.shape == (batch, action_dim), mu.shape
    assert cov.shape == (batch, action_dim), cov.shape
    assert bool(jnp.all(cov >= 0))
    assert bool(jnp.allclose(mu, mu_ref, atol=1e-5, rtol=1e-5))
    assert bool(jnp.allclose(cov, cov_ref, atol=1e-5, rtol=1e-5))

    # 2) Default fast path: bf16 MXU operands, f32 accumulation/transcendentals.
    prep_bf16 = prepare_params(params)   # compute_dtype=jnp.bfloat16
    mu_b, cov_b = gaussian_policy_forward(x, prep_bf16)
    jax.block_until_ready((mu_b, cov_b))
    assert bool(jnp.allclose(mu_b, mu_ref, atol=3e-2, rtol=3e-2))
    assert bool(jnp.allclose(cov_b, cov_ref, atol=3e-2, rtol=3e-2))

    # 3) K-tiled hidden (streamed over the 'arbitrary' grid axis) + ragged /
    #    multi-tile batch, f32 for exact comparison.
    batch2, hidden2 = 24, 256
    x2 = jax.random.normal(jax.random.PRNGKey(1), (batch2, obs_dim), jnp.float32)
    params2 = init_params(jax.random.PRNGKey(2), obs_dim, hidden2, action_dim)
    prep2 = prepare_params(params2, compute_dtype=jnp.float32,
                           max_resident_hidden=128, block_hidden=128)
    mu2, cov2 = gaussian_policy_forward(x2, prep2, block_batch=16)
    jax.block_until_ready((mu2, cov2))
    mu2_ref, cov2_ref = _reference_forward(x2, params2)
    assert bool(jnp.allclose(mu2, mu2_ref, atol=1e-5, rtol=1e-5))
    assert bool(jnp.allclose(cov2, cov2_ref, atol=1e-5, rtol=1e-5))

    # TODO(synk): Normal(mu, cov).sample()/log_prob/entropy and the action
    # rescaling/clipping in get_action are distribution-object semantics left
    # outside the kernel; the kernel produces the distribution parameters
    # (mu, cov) exactly as forward() does.
    print("KERNEL_OK")
</pallas_src>

<mosaic_0001>
module attributes {stable_mosaic.version = 11 : i64} {
  func.func @gaussian_policy_kernel(%arg0: i32, %arg1: i32, %arg2: memref<8x16xf32, #tpu.memory_space<vmem>>, %arg3: memref<16x128xf32, #tpu.memory_space<vmem>>, %arg4: memref<1x128xf32, #tpu.memory_space<vmem>>, %arg5: memref<128x128xf32, #tpu.memory_space<vmem>>, %arg6: memref<1x128xf32, #tpu.memory_space<vmem>>, %arg7: memref<128x128xf32, #tpu.memory_space<vmem>>, %arg8: memref<1x128xf32, #tpu.memory_space<vmem>>, %arg9: memref<8x128xf32, #tpu.memory_space<vmem>>, %arg10: memref<8x128xf32, #tpu.memory_space<vmem>>) attributes {dimension_semantics = [#tpu.dimension_semantics<parallel>, #tpu.dimension_semantics<arbitrary>], iteration_bounds = array<i64: 1, 1>, scalar_prefetch = 0 : i64, scratch_operands = 1 : i64, tpu.core_type = #tpu.core_type<tc>, window_params = [{transform_indices = @transform_0, window_bounds = array<i64: 8, 16>}, {pipeline_mode = #tpu.pipeline_mode<synchronous>, transform_indices = @transform_1, window_bounds = array<i64: 16, 128>}, {pipeline_mode = #tpu.pipeline_mode<synchronous>, transform_indices = @transform_2, window_bounds = array<i64: 1, 128>}, {pipeline_mode = #tpu.pipeline_mode<synchronous>, transform_indices = @transform_3, window_bounds = array<i64: 128, 128>}, {pipeline_mode = #tpu.pipeline_mode<synchronous>, transform_indices = @transform_4, window_bounds = array<i64: 1, 128>}, {pipeline_mode = #tpu.pipeline_mode<synchronous>, transform_indices = @transform_5, window_bounds = array<i64: 128, 128>}, {pipeline_mode = #tpu.pipeline_mode<synchronous>, transform_indices = @transform_6, window_bounds = array<i64: 1, 128>}, {transform_indices = @transform_7, window_bounds = array<i64: 8, 128>}]} {
    %c0_i32 = arith.constant 0 : i32
    %0 = arith.cmpi eq, %arg1, %c0_i32 : i32
    %1 = arith.extui %0 : i1 to i32
    %c0_i32_0 = arith.constant 0 : i32
    %2 = arith.cmpi ne, %1, %c0_i32_0 : i32
    scf.if %2 {
      %cst_15 = arith.constant 0.000000e+00 : f32
      %18 = vector.broadcast %cst_15 : f32 to vector<8x128xf32>
      %c0_16 = arith.constant 0 : index
      %c0_17 = arith.constant 0 : index
      %19 = vector.load %arg10[%c0_16, %c0_17] : memref<8x128xf32, #tpu.memory_space<vmem>>, vector<8x128xf32>
      tpu.vector_store %arg10[%c0_16, %c0_17], %18 {strides = array<i32>} : memref<8x128xf32, #tpu.memory_space<vmem>>, vector<8x128xf32>,
    } else {
    }
    %c0 = arith.constant 0 : index
    %c0_1 = arith.constant 0 : index
    %3 = vector.load %arg2[%c0, %c0_1] : memref<8x16xf32, #tpu.memory_space<vmem>>, vector<8x16xf32>
    %c0_2 = arith.constant 0 : index
    %c0_3 = arith.constant 0 : index
    %4 = vector.load %arg3[%c0_2, %c0_3] : memref<16x128xf32, #tpu.memory_space<vmem>>, vector<16x128xf32>
    %cst = arith.constant dense<0.000000e+00> : vector<8x128xf32>
    %5 = tpu.matmul %3, %4, %cst {dimension_numbers = #tpu.dot_dimension_numbers<[1], [0], [0], [1], [0, 0, 1, 1], [], []>} : vector<8x16xf32>, vector<16x128xf32>, vector<8x128xf32> -> vector<8x128xf32>
    %c0_4 = arith.constant 0 : index
    %c0_5 = arith.constant 0 : index
    %6 = vector.load %arg4[%c0_4, %c0_5] : memref<1x128xf32, #tpu.memory_space<vmem>>, vector<1x128xf32>
    %7 = vector.broadcast %6 : vector<1x128xf32> to vector<8x128xf32>
    %8 = arith.addf %5, %7 : vector<8x128xf32>
    %9 = math.tanh %8 : vector<8x128xf32>
    %c0_6 = arith.constant 0 : index
    %c0_7 = arith.constant 0 : index
    %10 = vector.load %arg10[%c0_6, %c0_7] : memref<8x128xf32, #tpu.memory_space<vmem>>, vector<8x128xf32>
    %c0_8 = arith.constant 0 : index
    %c0_9 = arith.constant 0 : index
    %11 = vector.load %arg5[%c0_8, %c0_9] : memref<128x128xf32, #tpu.memory_space<vmem>>, vector<128x128xf32>
    %cst_10 = arith.constant dense<0.000000e+00> : vector<8x128xf32>
    %12 = tpu.matmul %9, %11, %cst_10 {dimension_numbers = #tpu.dot_dimension_numbers<[1], [0], [0], [1], [0, 0, 1, 1], [], []>} : vector<8x128xf32>, vector<128x128xf32>, vector<8x128xf32> -> vector<8x128xf32>
    %13 = arith.addf %10, %12 : vector<8x128xf32>
    %c0_11 = arith.constant 0 : index
    %c0_12 = arith.constant 0 : index
    %14 = vector.load %arg10[%c0_11, %c0_12] : memref<8x128xf32, #tpu.memory_space<vmem>>, vector<8x128xf32>
    tpu.vector_store %arg10[%c0_11, %c0_12], %13 {strides = array<i32>} : memref<8x128xf32, #tpu.memory_space<vmem>>, vector<8x128xf32>,
    %c0_i32_13 = arith.constant 0 : i32
    %15 = arith.cmpi eq, %arg1, %c0_i32_13 : i32
    %16 = arith.extui %15 : i1 to i32
    %c0_i32_14 = arith.constant 0 : i32
    %17 = arith.cmpi ne, %16, %c0_i32_14 : i32
    scf.if %17 {
      %c0_15 = arith.constant 0 : index
      %c0_16 = arith.constant 0 : index
      %18 = vector.load %arg10[%c0_15, %c0_16] : memref<8x128xf32, #tpu.memory_space<vmem>>, vector<8x128xf32>
      %c0_17 = arith.constant 0 : index
      %c0_18 = arith.constant 0 : index
      %19 = vector.load %arg6[%c0_17, %c0_18] : memref<1x128xf32, #tpu.memory_space<vmem>>, vector<1x128xf32>
      %20 = vector.broadcast %19 : vector<1x128xf32> to vector<8x128xf32>
      %21 = arith.addf %18, %20 : vector<8x128xf32>
      %22 = math.tanh %21 : vector<8x128xf32>
      %c0_19 = arith.constant 0 : index
      %c0_20 = arith.constant 0 : index
      %23 = vector.load %arg7[%c0_19, %c0_20] : memref<128x128xf32, #tpu.memory_space<vmem>>, vector<128x128xf32>
      %cst_21 = arith.constant dense<0.000000e+00> : vector<8x128xf32>
      %24 = tpu.matmul %22, %23, %cst_21 {dimension_numbers = #tpu.dot_dimension_numbers<[1], [0], [0], [1], [0, 0, 1, 1], [], []>} : vector<8x128xf32>, vector<128x128xf32>, vector<8x128xf32> -> vector<8x128xf32>
      %c0_22 = arith.constant 0 : index
      %c0_23 = arith.constant 0 : index
      %25 = vector.load %arg8[%c0_22, %c0_23] : memref<1x128xf32, #tpu.memory_space<vmem>>, vector<1x128xf32>
      %26 = vector.broadcast %25 : vector<1x128xf32> to vector<8x128xf32>
      %27 = arith.addf %24, %26 : vector<8x128xf32>
      %28 = math.tanh %27 : vector<8x128xf32>
      %29 = math.exp %27 : vector<8x128xf32>
      %cst_24 = arith.constant 1.000000e+00 : f32
      %30 = vector.broadcast %cst_24 : f32 to vector<8x128xf32>
      %31 = arith.addf %30, %29 : vector<8x128xf32>
      %cst_25 = arith.constant 1.000000e+00 : f32
      %32 = vector.broadcast %cst_25 : f32 to vector<8x128xf32>
      %33 = arith.addf %32, %29 : vector<8x128xf32>
      %34 = arith.mulf %31, %33 : vector<8x128xf32>
      %35 = tpu.iota {dimensions = array<i32: 1>} : vector<8x128xi32>
      %c4_i32 = arith.constant 4 : i32
      %36 = vector.broadcast %c4_i32 : i32 to vector<8x128xi32>
      %37 = arith.cmpi slt, %35, %36 : vector<8x128xi32>
      %38 = arith.select %37, %28, %34 : vector<8x128xi1>, vector<8x128xf32>
      %c0_26 = arith.constant 0 : index
      %c0_27 = arith.constant 0 : index
      %39 = vector.load %arg9[%c0_26, %c0_27] : memref<8x128xf32, #tpu.memory_space<vmem>>, vector<8x128xf32>
      tpu.vector_store %arg9[%c0_26, %c0_27], %38 {strides = array<i32>} : memref<8x128xf32, #tpu.memory_space<vmem>>, vector<8x128xf32>,
    } else {
    }
    return
  }
  func.func @transform_0(%arg0: i32, %arg1: i32) -> (i32, i32) {
    %c0_i32 = arith.constant 0 : i32
    %c0_i32_0 = arith.constant 0 : i32
    return %arg0, %c0_i32 : i32, i32
  }
  func.func @transform_1(%arg0: i32, %arg1: i32) -> (i32, i32) {
    %c0_i32 = arith.constant 0 : i32
    %c0_i32_0 = arith.constant 0 : i32
    return %c0_i32, %arg1 : i32, i32
  }
  func.func @transform_2(%arg0: i32, %arg1: i32) -> (i32, i32) {
    %c0_i32 = arith.constant 0 : i32
    %c0_i32_0 = arith.constant 0 : i32
    return %c0_i32, %arg1 : i32, i32
  }
  func.func @transform_3(%arg0: i32, %arg1: i32) -> (i32, i32) {
    %c0_i32 = arith.constant 0 : i32
    %c0_i32_0 = arith.constant 0 : i32
    return %arg1, %c0_i32 : i32, i32
  }
  func.func @transform_4(%arg0: i32, %arg1: i32) -> (i32, i32) {
    %c0_i32 = arith.constant 0 : i32
    %c0_i32_0 = arith.constant 0 : i32
    %c0_i32_1 = arith.constant 0 : i32
    return %c0_i32, %c0_i32_0 : i32, i32
  }
  func.func @transform_5(%arg0: i32, %arg1: i32) -> (i32, i32) {
    %c0_i32 = arith.constant 0 : i32
    %c0_i32_0 = arith.constant 0 : i32
    %c0_i32_1 = arith.constant 0 : i32
    return %c0_i32, %c0_i32_0 : i32, i32
  }
  func.func @transform_6(%arg0: i32, %arg1: i32) -> (i32, i32) {
    %c0_i32 = arith.constant 0 : i32
    %c0_i32_0 = arith.constant 0 : i32
    %c0_i32_1 = arith.constant 0 : i32
    return %c0_i32, %c0_i32_0 : i32, i32
  }
  func.func @transform_7(%arg0: i32, %arg1: i32) -> (i32, i32) {
    %c0_i32 = arith.constant 0 : i32
    %c0_i32_0 = arith.constant 0 : i32
    return %arg0, %c0_i32 : i32, i32
  }
}

</mosaic_0001>

<bundles_post_ra>
// kernel: _forward_impl.1
= control target key start
LH: loop header
LB: loop body
LE: loop exit
PB: predicated region body
PF: predicated region fallthrough
CT: control target
= control target key end

     0   :  { %12 = vsyncpa [#allocation4], 0  ;;  %s459_s0 = inlined_call_operand.hbm [shape: f32[8,16], index: 0, kind: input, shape index: {}]   ;;  %s460_s1 = inlined_call_operand.hbm [shape: f32[16,128], index: 1, kind: input, shape index: {}]   ;;  %s461_s2 = inlined_call_operand.hbm [shape: f32[1,128], index: 2, kind: input, shape index: {}]   ;;  %s462_s3 = inlined_call_operand.hbm [shape: f32[128,128], index: 3, kind: input, shape index: {}]   ;;  %s463_s4 = inlined_call_operand.vmem [shape: f32[1,128], index: 4, kind: input, shape index: {}]   ;;  %s464_s5 = inlined_call_operand.hbm [shape: f32[128,128], index: 5, kind: input, shape index: {}]   ;;  %s465_s6 = inlined_call_operand.vmem [shape: f32[1,128], index: 6, kind: input, shape index: {}]   ;;  %s466_s7 = inlined_call_operand.vmem [shape: f32[8,128], index: 7, kind: output, shape index: {}]  }
   0x1   :  { %13 = vsyncpa [#allocation6], 0  ;;  %s30_s26 = sshll.u32 %s460_s1, 4  ;;  %s31_s26 = int_to_ptr.hbm [resolvable:$true] %s30_s26 }
   0x2   :  { %14 = vsyncpa [#allocation9], 0  ;;  %s388_s27 = smov [#allocation5]   ;;  %s54_s8 = sshll.u32 %s462_s3, 4  ;;  %s55_s8 = int_to_ptr.hbm [resolvable:$true] %s54_s8 }
   0x3   :  { %s32_s28 = sshll.u32 %s388_s27, 4  ;;  %s389_s9 = smov 128   ;;  %s33_s28 = int_to_ptr.vmem [resolvable:$true] %s32_s28 }
   0x4   :  { %s390_s10 = smov 8   ;;  %s391_s11 = smov [#allocation8]  }
   0x5   :  { %38 = dma.hbm_to_vmem [thread:$0]  %s31_s26, 256, %s33_s28, [#allocation6], %s389_s9, %s389_s9, %s390_s10  }
   0x6   :  { %s56_s12 = sshll.u32 %s391_s11, 4  ;;  %s20_s15 = sshll.u32 %s459_s0, 4  ;;  %s57_s12 = int_to_ptr.vmem [resolvable:$true] %s56_s12  ;;  %s21_s15 = int_to_ptr.hbm [resolvable:$true] %s20_s15 }
   0x7   :  { %62 = dma.hbm_to_vmem [thread:$0]  %s55_s8, 2048, %s57_s12, [#allocation9], %s389_s9, %s389_s9, %s390_s10  }
   0x8   :  { %s44_s17 = sshll.u32 %s461_s2, 4  ;;  %s392_s18 = smov [#allocation3]   ;;  %s45_s17 = int_to_ptr.hbm [resolvable:$true] %s44_s17 }
   0x9   :  { %s22_s19 = sshll.u32 %s392_s18, 4  ;;  %s393_s3 = smov [#allocation7]   ;;  %s23_s19 = int_to_ptr.vmem [resolvable:$true] %s22_s19 }
   0xa   :  { %25 = dma.hbm_to_vmem [thread:$0]  %s21_s15, 128, %s23_s19, [#allocation4]  }
   0xb   :  { %s46_s20 = sshll.u32 %s393_s3, 4  ;;  %s69_s23 = sshll.u32 %s464_s5, 4  ;;  %s47_s20 = int_to_ptr.vmem [resolvable:$true] %s46_s20  ;;  %s70_s23 = int_to_ptr.hbm [resolvable:$true] %s69_s23 }
   0xc   :  { %49 = dma.hbm_to_vmem [thread:$0]  %s45_s17, 16, %s47_s20, [#allocation6]  }
   0xd   :  { %s394_s0 = smov [#allocation10]  }
   0xe   :  { %s71_s24 = sshll.u32 %s394_s0, 4  ;;  %s72_s24 = int_to_ptr.vmem [resolvable:$true] %s71_s24 }
   0xf   :  { %77 = dma.hbm_to_vmem [thread:$0]  %s70_s23, 2048, %s72_s24, [#allocation9], %s389_s9, %s389_s9, %s390_s10  }
  0x10   :  { %382 = dma.done.wait [#allocation4], 128  }
  0x11   :  { %383 = vsyncadd [#allocation4], 4294967168 }
  0x12   :  { %384 = dma.done.wait [#allocation6], 272  }
  0x13   :  { %385 = vsyncadd [#allocation6], 4294967024 }
  0x14   :  { %386 = dma.done.wait [#allocation9], 4096  }
  0x15   :  { %387 = vsyncadd [#allocation9], 4294963200  ;;  %v107_v0 = vld [vmem:[#allocation5 + $0x8] sm:$0xff]  ;;  %v106_v1 = vld [vmem:[#allocation5] sm:$0xff]  ;;  %vm112_vm0 = vcmask 130048   ;;  %v231_v47 = vlaneseq }
  0x16   :  { %130 = vmatpush.msra.mxu0 %v107_v0  ;;  %v105_v2 = vld [vmem:[#allocation3] sm:$0xff]  ;;  %v153_v3 = vld [vmem:[#allocation8 + $0x78] sm:$0xff]  ;;  %v152_v4 = vld [vmem:[#allocation8 + $0x70] sm:$0xff] }
  0x17   :  { %154 = vmatpush.msra.mxu1 %v153_v3  ;;  %v151_v5 = vld [vmem:[#allocation8 + $0x68] sm:$0xff]  ;;  %v150_v6 = vld [vmem:[#allocation8 + $0x60] sm:$0xff]  ;;  %v149_v7 = vld [vmem:[#allocation8 + $0x58] sm:$0xff]  ;;  %v232_v48 = vand.u32 127, %v231_v47 }
  0x18   :  { %131 = vmatpush.msra.mxu0 %v106_v1  ;;  %v148_v8 = vld [vmem:[#allocation8 + $0x50] sm:$0xff]  ;;  %v147_v9 = vld [vmem:[#allocation8 + $0x48] sm:$0xff]  ;;  %v146_v10 = vld [vmem:[#allocation8 + $0x40] sm:$0xff] }
  0x19   :  { %243 = vmatmul.msk.f32.vlgmr.msra.gmra.mxu0 %vm112_vm0, %v105_v2  ;;  %155 = vmatpush.msra.mxu1 %v152_v4  ;;  %v145_v11 = vld [vmem:[#allocation8 + $0x38] sm:$0xff]  ;;  %v144_v12 = vld [vmem:[#allocation8 + $0x30] sm:$0xff]  ;;  %v143_v13 = vld [vmem:[#allocation8 + $0x28] sm:$0xff]  ;;  %vm233_vm1 = vcmp.lt.s32.totalorder %v232_v48, 4 }
  0x1a   :  { %v142_v14 = vld [vmem:[#allocation8 + $0x20] sm:$0xff]  ;;  %v141_v15 = vld [vmem:[#allocation8 + $0x18] sm:$0xff]  ;;  %v140_v16 = vld [vmem:[#allocation8 + $0x10] sm:$0xff] }
  0x1b   :  { %156 = vmatpush.msra.mxu1 %v151_v5  ;;  %v139_v17 = vld [vmem:[#allocation8 + $0x8] sm:$0xff]  ;;  %v138_v18 = vld [vmem:[#allocation8] sm:$0xff]  ;;  %v201_v19 = vld [vmem:[#allocation10 + $0x78] sm:$0xff] }
  0x1c   :  { %v200_v20 = vld [vmem:[#allocation10 + $0x70] sm:$0xff]  ;;  %206 = vmatpush.msra.mxu2 %v201_v19  ;;  %v199_v21 = vld [vmem:[#allocation10 + $0x68] sm:$0xff]  ;;  %v198_v22 = vld [vmem:[#allocation10 + $0x60] sm:$0xff] }
  0x1d   :  { %157 = vmatpush.msra.mxu1 %v150_v6  ;;  %v197_v23 = vld [vmem:[#allocation10 + $0x58] sm:$0xff]  ;;  %v196_v24 = vld [vmem:[#allocation10 + $0x50] sm:$0xff]  ;;  %v195_v25 = vld [vmem:[#allocation10 + $0x48] sm:$0xff] }
  0x1e   :  { %207 = vmatpush.msra.mxu2 %v200_v20  ;;  %v194_v26 = vld [vmem:[#allocation10 + $0x40] sm:$0xff]  ;;  %v193_v27 = vld [vmem:[#allocation10 + $0x38] sm:$0xff]  ;;  %v192_v28 = vld [vmem:[#allocation10 + $0x30] sm:$0xff] }
  0x1f   :  { %158 = vmatpush.msra.mxu1 %v149_v7  ;;  %v191_v29 = vld [vmem:[#allocation10 + $0x28] sm:$0xff]  ;;  %v251_v30 = vld [vmem:[#allocation7] ss:$0 sm:$0xff]  ;;  %v190_v34 = vld [vmem:[#allocation10 + $0x20] sm:$0xff] }
  0x20   :  { %208 = vmatpush.msra.mxu2 %v199_v21  ;;  %v189_v35 = vld [vmem:[#allocation10 + $0x18] sm:$0xff]  ;;  %v188_v36 = vld [vmem:[#allocation10 + $0x10] sm:$0xff]  ;;  %v187_v37 = vld [vmem:[#allocation10 + $0x8] sm:$0xff] }
  0x21   :  { %159 = vmatpush.msra.mxu1 %v148_v8  ;;  %v186_v38 = vld [vmem:[#allocation10] sm:$0xff] }
  0x22   :  { %209 = vmatpush.msra.mxu2 %v198_v22  ;;  %v252_v39 = vld [vmem:[%s463_s4] ss:$0 sm:$0xff] }
  0x23   :  { %160 = vmatpush.msra.mxu1 %v147_v9  ;;  %v253_v43 = vld [vmem:[%s465_s6] ss:$0 sm:$0xff] }
  0x24   :  { %210 = vmatpush.msra.mxu2 %v197_v23 }
  0x25   :  { %161 = vmatpush.msra.mxu1 %v146_v10 }
  0x26   :  { %211 = vmatpush.msra.mxu2 %v196_v24 }
  0x27   :  { %162 = vmatpush.msra.mxu1 %v145_v11 }
  0x28   :  { %212 = vmatpush.msra.mxu2 %v195_v25 }
  0x29   :  { %163 = vmatpush.msra.mxu1 %v144_v12 }
  0x2a   :  { %213 = vmatpush.msra.mxu2 %v194_v26 }
  0x2b   :  { %164 = vmatpush.msra.mxu1 %v143_v13 }
  0x2c   :  { %214 = vmatpush.msra.mxu2 %v193_v27 }
  0x2d   :  { %165 = vmatpush.msra.mxu1 %v142_v14 }
  0x2e   :  { %215 = vmatpush.msra.mxu2 %v192_v28 }
  0x2f   :  { %166 = vmatpush.msra.mxu1 %v141_v15 }
  0x30   :  { %216 = vmatpush.msra.mxu2 %v191_v29 }
  0x31   :  { %167 = vmatpush.msra.mxu1 %v140_v16 }
  0x32   :  { %217 = vmatpush.msra.mxu2 %v190_v34 }
  0x33   :  { %168 = vmatpush.msra.mxu1 %v139_v17 }
  0x34   :  { %218 = vmatpush.msra.mxu2 %v189_v35 }
  0x35   :  { %169 = vmatpush.msra.mxu1 %v138_v18 }
  0x36   :  { %219 = vmatpush.msra.mxu2 %v188_v36 }
  0x38   :  { %220 = vmatpush.msra.mxu2 %v187_v37 }
  0x3a   :  { %221 = vmatpush.msra.mxu2 %v186_v38 }
  0x96   :  { %v133_v31 = vpop.f32.mrf.mxu0 }
  0x97   :  { %v134_v32 = vadd.f32 %v251_v30, %v133_v31 }
  0x99   :  { %254 = vtanh.f32 %v134_v32 }
  0x9f   :  { %v255_v33 = vpop.eup %254 }
  0xa0   :  { %170 = vmatmul.f32.vlgmr.msra.gmra.mxu1 %v255_v33 }
 0x11d   :  { %v171_v40 = vpop.f32.mrf.mxu1 }
 0x11e   :  { %v184_v41 = vadd.f32 %v252_v39, %v171_v40 }
 0x120   :  { %256 = vtanh.f32 %v184_v41 }
 0x126   :  { %v257_v42 = vpop.eup %256 }
 0x127   :  { %222 = vmatmul.f32.vlgmr.msra.gmra.mxu2 %v257_v42 }
 0x1aa   :  { %v223_v44 = vpop.f32.mrf.mxu2 }
 0x1ab   :  { %v224_v45 = vadd.f32 %v253_v43, %v223_v44 }
 0x1ad   :  { %v227_v46 = vmul.f32 1.442695, %v224_v45 }
 0x1af   :  { %258 = vpow2.f32 %v227_v46 }
 0x1b0   :  { %260 = vtanh.f32 %v224_v45 }
 0x1b5   :  { %v259_v49 = vpop.eup %258 }
 0x1b6   :  { %v229_v50 = vadd.f32 1.0, %v259_v49  ;;  %v261_v52 = vpop.eup %260 }
 0x1b8   :  { %v230_v51 = vmul.f32 %v229_v50, %v229_v50 }
 0x1ba   :  { %v234_v53 = vsel %vm233_vm1, %v261_v52, %v230_v51 }
 0x1bb   :  { %235 = vst [vmem:[%s466_s7] sm:$0xff] %v234_v53 }
 0x1bc   :  { %240 = vsyncpa [#allocation4], 1 }
 0x1bd   :  { %241 = vsyncpa [#allocation6], 1 }
 0x1be   :  { %242 = vsyncpa [#allocation9], 1 }

</bundles_post_ra>
